<compile_context>
chip_gen: v7x
topology: tpu7x:2x2x1
jax: 0.10.0
libtpu: 0.0.40
codegen_flags: <defaults>
</compile_context>

<pallas_src>
import math
from functools import partial

import jax
import jax.numpy as jnp
from jax.experimental import pallas as pl
from jax.experimental.pallas import tpu as pltpu

# Logical (PyTorch) layer sizes.
DIMS = [6, 100, 50, 10, 1]
IN_PAD = 16     # 6 real input features, padded to 16 lanes (bf16-friendly)
HID_PAD = 128   # hidden dims (100, 50, 10) padded to one lane-dense tile


def _round_up(x, m):
    return ((x + m - 1) // m) * m


def _pad2d(a, rows, cols):
    r, c = a.shape
    return jnp.pad(a, ((0, rows - r), (0, cols - c)))


def _mlp_kernel(x_ref, w1_ref, w2_ref, w3_ref, c_ref, o_ref):
    """Fused 4-layer MLP forward on one (TB, IN_PAD) batch tile.

    c_ref rows: 0=b1, 1=b2, 2=b3, 3=w4 (as a row), 4=b4 (lane 0).
    """
    x = x_ref[...]                      # (TB, 16) bf16
    b1 = c_ref[0:1, :]                  # (1, 128) f32
    b2 = c_ref[1:2, :]
    b3 = c_ref[2:3, :]
    w4 = c_ref[3:4, :]                  # (1, 128) f32, real weights in lanes 0..9
    b4 = c_ref[4:5, 0:1]                # (1, 1)   f32

    h1 = jnp.tanh(
        jnp.dot(x, w1_ref[...], preferred_element_type=jnp.float32) + b1)
    # Dropout(0.2): identity in eval/inference mode.
    h2 = jnp.tanh(
        jnp.dot(h1.astype(jnp.bfloat16), w2_ref[...],
                preferred_element_type=jnp.float32) + b2)
    # Dropout(0.2): identity in eval/inference mode.
    h3 = jnp.tanh(
        jnp.dot(h2.astype(jnp.bfloat16), w3_ref[...],
                preferred_element_type=jnp.float32) + b3)
    # Final 10->1 layer: VPU multiply + lane reduce (padded lanes are zero).
    logits = jnp.sum(h3 * w4, axis=-1, keepdims=True) + b4      # (TB, 1)
    o_ref[...] = jax.nn.sigmoid(logits)


def init_params(key):
    """Deterministic init mimicking nn.Linear default (U[-1/sqrt(fan_in), +])."""
    params = []
    for i in range(len(DIMS) - 1):
        fan_in, fan_out = DIMS[i], DIMS[i + 1]
        key, kw, kb = jax.random.split(key, 3)
        bound = 1.0 / math.sqrt(fan_in)
        # Stored as (in, out) so the kernel computes x @ W + b.
        w = jax.random.uniform(kw, (fan_in, fan_out), jnp.float32, -bound, bound)
        b = jax.random.uniform(kb, (fan_out,), jnp.float32, -bound, bound)
        params.append((w, b))
    return params


def prepare_params(params):
    """One-time padding / packing / bf16 cast of the weights (NOT per forward)."""
    (w1, b1), (w2, b2), (w3, b3), (w4, b4) = params
    w1p = _pad2d(w1, IN_PAD, HID_PAD).astype(jnp.bfloat16)     # (6,100)  -> (16,128)
    w2p = _pad2d(w2, HID_PAD, HID_PAD).astype(jnp.bfloat16)    # (100,50) -> (128,128)
    w3p = _pad2d(w3, HID_PAD, HID_PAD).astype(jnp.bfloat16)    # (50,10)  -> (128,128)
    # Pack b1,b2,b3, the last-layer weight row and b4 into a single f32 block.
    consts = jnp.zeros((8, HID_PAD), jnp.float32)
    consts = consts.at[0, :DIMS[1]].set(b1)
    consts = consts.at[1, :DIMS[2]].set(b2)
    consts = consts.at[2, :DIMS[3]].set(b3)
    consts = consts.at[3, :DIMS[3]].set(w4[:, 0])              # (10,1) -> row
    consts = consts.at[4, 0].set(b4[0])
    return w1p, w2p, w3p, consts


@partial(jax.jit, static_argnames=("block_rows",))
def action_conditioned_ff_forward(x, prepared, *, block_rows=1024):
    """x: [B, 6] float -> [B, 1] float32 (sigmoid probabilities)."""
    w1p, w2p, w3p, consts = prepared
    B, F = x.shape
    # Batch tile: multiple of 16 (bf16 sublane packing), capped at block_rows.
    TB = min(block_rows, _round_up(B, 16))
    Bp = _round_up(B, TB)
    x_p = jnp.pad(x.astype(jnp.bfloat16), ((0, Bp - B), (0, IN_PAD - F)))

    out = pl.pallas_call(
        _mlp_kernel,
        out_shape=jax.ShapeDtypeStruct((Bp, 1), jnp.float32),
        grid=(Bp // TB,),
        in_specs=[
            pl.BlockSpec((TB, IN_PAD), lambda i: (i, 0)),        # x tile
            pl.BlockSpec((IN_PAD, HID_PAD), lambda i: (0, 0)),   # w1 (resident)
            pl.BlockSpec((HID_PAD, HID_PAD), lambda i: (0, 0)),  # w2 (resident)
            pl.BlockSpec((HID_PAD, HID_PAD), lambda i: (0, 0)),  # w3 (resident)
            pl.BlockSpec((8, HID_PAD), lambda i: (0, 0)),        # biases + w4 row
        ],
        out_specs=pl.BlockSpec((TB, 1), lambda i: (i, 0)),
        compiler_params=pltpu.CompilerParams(
            dimension_semantics=("parallel",),
            vmem_limit_bytes=32 * 1024 * 1024,
        ),
    )(x_p, w1p, w2p, w3p, consts)

    return out[:B, :]


def reference_forward(x, params):
    """Pure-JAX reference matching the kernel's bf16 weight/input quantization."""
    h = x.astype(jnp.bfloat16).astype(jnp.float32)
    for i, (w, b) in enumerate(params):
        if i < 3:
            w = w.astype(jnp.bfloat16).astype(jnp.float32)
        h = h @ w + b
        if i < 3:
            h = jnp.tanh(h)
    return jax.nn.sigmoid(h)


if __name__ == "__main__":
    key = jax.random.PRNGKey(0)
    kp, kx1, kx2 = jax.random.split(key, 3)
    params = init_params(kp)
    prepared = prepare_params(params)

    # Case 1: tiny batch (single grid step).
    x1 = jax.random.normal(kx1, (8, 6), dtype=jnp.float32)
    y1 = jax.block_until_ready(action_conditioned_ff_forward(x1, prepared))
    ref1 = reference_forward(x1, params)
    assert y1.shape == (8, 1)
    assert jnp.allclose(y1, ref1, atol=2e-2, rtol=0), (y1, ref1)

    # Case 2: multi-tile grid with ragged batch (exercises pipelining + padding).
    x2 = jax.random.normal(kx2, (100, 6), dtype=jnp.float32)
    y2 = jax.block_until_ready(
        action_conditioned_ff_forward(x2, prepared, block_rows=16))
    ref2 = reference_forward(x2, params)
    assert y2.shape == (100, 1)
    assert jnp.allclose(y2, ref2, atol=2e-2, rtol=0), (y2, ref2)

    print("KERNEL_OK")
</pallas_src>

<mosaic_0001>
module attributes {stable_mosaic.version = 11 : i64} {
  func.func @_mlp_kernel(%arg0: i32, %arg1: memref<16x16xbf16, #tpu.memory_space<vmem>>, %arg2: memref<16x128xbf16, #tpu.memory_space<vmem>>, %arg3: memref<128x128xbf16, #tpu.memory_space<vmem>>, %arg4: memref<128x128xbf16, #tpu.memory_space<vmem>>, %arg5: memref<8x128xf32, #tpu.memory_space<vmem>>, %arg6: memref<16x1xf32, #tpu.memory_space<vmem>>) attributes {dimension_semantics = [#tpu.dimension_semantics<parallel>], iteration_bounds = array<i64: 1>, scalar_prefetch = 0 : i64, scratch_operands = 0 : i64, tpu.core_type = #tpu.core_type<tc>, window_params = [{transform_indices = @transform_0, window_bounds = array<i64: 16, 16>}, {pipeline_mode = #tpu.pipeline_mode<synchronous>, transform_indices = @transform_1, window_bounds = array<i64: 16, 128>}, {pipeline_mode = #tpu.pipeline_mode<synchronous>, transform_indices = @transform_2, window_bounds = array<i64: 128, 128>}, {pipeline_mode = #tpu.pipeline_mode<synchronous>, transform_indices = @transform_3, window_bounds = array<i64: 128, 128>}, {pipeline_mode = #tpu.pipeline_mode<synchronous>, transform_indices = @transform_4, window_bounds = array<i64: 8, 128>}, {transform_indices = @transform_5, window_bounds = array<i64: 16, 1>}]} {
    %c0 = arith.constant 0 : index
    %c0_0 = arith.constant 0 : index
    %0 = vector.load %arg1[%c0, %c0_0] : memref<16x16xbf16, #tpu.memory_space<vmem>>, vector<16x16xbf16>
    %c0_1 = arith.constant 0 : index
    %c0_2 = arith.constant 0 : index
    %1 = vector.load %arg5[%c0_1, %c0_2] : memref<8x128xf32, #tpu.memory_space<vmem>>, vector<1x128xf32>
    %c1 = arith.constant 1 : index
    %c0_3 = arith.constant 0 : index
    %2 = vector.load %arg5[%c1, %c0_3] : memref<8x128xf32, #tpu.memory_space<vmem>>, vector<1x128xf32>
    %c2 = arith.constant 2 : index
    %c0_4 = arith.constant 0 : index
    %3 = vector.load %arg5[%c2, %c0_4] : memref<8x128xf32, #tpu.memory_space<vmem>>, vector<1x128xf32>
    %c3 = arith.constant 3 : index
    %c0_5 = arith.constant 0 : index
    %4 = vector.load %arg5[%c3, %c0_5] : memref<8x128xf32, #tpu.memory_space<vmem>>, vector<1x128xf32>
    %c4 = arith.constant 4 : index
    %c0_6 = arith.constant 0 : index
    %5 = vector.load %arg5[%c4, %c0_6] : memref<8x128xf32, #tpu.memory_space<vmem>>, vector<1x1xf32>
    %c0_7 = arith.constant 0 : index
    %c0_8 = arith.constant 0 : index
    %6 = vector.load %arg2[%c0_7, %c0_8] : memref<16x128xbf16, #tpu.memory_space<vmem>>, vector<16x128xbf16>
    %cst = arith.constant dense<0.000000e+00> : vector<16x128xf32>
    %7 = tpu.matmul %0, %6, %cst {dimension_numbers = #tpu.dot_dimension_numbers<[1], [0], [0], [1], [0, 0, 1, 1], [], []>} : vector<16x16xbf16>, vector<16x128xbf16>, vector<16x128xf32> -> vector<16x128xf32>
    %8 = vector.broadcast %1 : vector<1x128xf32> to vector<16x128xf32>
    %9 = arith.addf %7, %8 : vector<16x128xf32>
    %10 = math.tanh %9 : vector<16x128xf32>
    %11 = arith.truncf %10 : vector<16x128xf32> to vector<16x128xbf16>
    %c0_9 = arith.constant 0 : index
    %c0_10 = arith.constant 0 : index
    %12 = vector.load %arg3[%c0_9, %c0_10] : memref<128x128xbf16, #tpu.memory_space<vmem>>, vector<128x128xbf16>
    %cst_11 = arith.constant dense<0.000000e+00> : vector<16x128xf32>
    %13 = tpu.matmul %11, %12, %cst_11 {dimension_numbers = #tpu.dot_dimension_numbers<[1], [0], [0], [1], [0, 0, 1, 1], [], []>} : vector<16x128xbf16>, vector<128x128xbf16>, vector<16x128xf32> -> vector<16x128xf32>
    %14 = vector.broadcast %2 : vector<1x128xf32> to vector<16x128xf32>
    %15 = arith.addf %13, %14 : vector<16x128xf32>
    %16 = math.tanh %15 : vector<16x128xf32>
    %17 = arith.truncf %16 : vector<16x128xf32> to vector<16x128xbf16>
    %c0_12 = arith.constant 0 : index
    %c0_13 = arith.constant 0 : index
    %18 = vector.load %arg4[%c0_12, %c0_13] : memref<128x128xbf16, #tpu.memory_space<vmem>>, vector<128x128xbf16>
    %cst_14 = arith.constant dense<0.000000e+00> : vector<16x128xf32>
    %19 = tpu.matmul %17, %18, %cst_14 {dimension_numbers = #tpu.dot_dimension_numbers<[1], [0], [0], [1], [0, 0, 1, 1], [], []>} : vector<16x128xbf16>, vector<128x128xbf16>, vector<16x128xf32> -> vector<16x128xf32>
    %20 = vector.broadcast %3 : vector<1x128xf32> to vector<16x128xf32>
    %21 = arith.addf %19, %20 : vector<16x128xf32>
    %22 = math.tanh %21 : vector<16x128xf32>
    %23 = vector.broadcast %4 : vector<1x128xf32> to vector<16x128xf32>
    %24 = arith.mulf %22, %23 : vector<16x128xf32>
    %cst_15 = arith.constant dense<0.000000e+00> : vector<16xf32>
    %25 = vector.multi_reduction <add>, %24, %cst_15 [1] : vector<16x128xf32> to vector<16xf32>
    %26 = vector.shape_cast %25 : vector<16xf32> to vector<16x1xf32>
    %27 = vector.broadcast %5 : vector<1x1xf32> to vector<16x1xf32>
    %28 = arith.addf %26, %27 : vector<16x1xf32>
    %29 = arith.negf %28 : vector<16x1xf32>
    %30 = math.exp %29 : vector<16x1xf32>
    %cst_16 = arith.constant 1.000000e+00 : f32
    %31 = vector.broadcast %cst_16 : f32 to vector<16x1xf32>
    %32 = arith.addf %31, %30 : vector<16x1xf32>
    %33 = arith.divf %31, %32 : vector<16x1xf32>
    %c0_17 = arith.constant 0 : index
    %c0_18 = arith.constant 0 : index
    %34 = vector.load %arg6[%c0_17, %c0_18] : memref<16x1xf32, #tpu.memory_space<vmem>>, vector<16x1xf32>
    tpu.vector_store %arg6[%c0_17, %c0_18], %33 {strides = array<i32>} : memref<16x1xf32, #tpu.memory_space<vmem>>, vector<16x1xf32>,
    return
  }
  func.func @transform_0(%arg0: i32) -> (i32, i32) {
    %c0_i32 = arith.constant 0 : i32
    %c0_i32_0 = arith.constant 0 : i32
    return %arg0, %c0_i32 : i32, i32
  }
  func.func @transform_1(%arg0: i32) -> (i32, i32) {
    %c0_i32 = arith.constant 0 : i32
    %c0_i32_0 = arith.constant 0 : i32
    %c0_i32_1 = arith.constant 0 : i32
    return %c0_i32, %c0_i32_0 : i32, i32
  }
  func.func @transform_2(%arg0: i32) -> (i32, i32) {
    %c0_i32 = arith.constant 0 : i32
    %c0_i32_0 = arith.constant 0 : i32
    %c0_i32_1 = arith.constant 0 : i32
    return %c0_i32, %c0_i32_0 : i32, i32
  }
  func.func @transform_3(%arg0: i32) -> (i32, i32) {
    %c0_i32 = arith.constant 0 : i32
    %c0_i32_0 = arith.constant 0 : i32
    %c0_i32_1 = arith.constant 0 : i32
    return %c0_i32, %c0_i32_0 : i32, i32
  }
  func.func @transform_4(%arg0: i32) -> (i32, i32) {
    %c0_i32 = arith.constant 0 : i32
    %c0_i32_0 = arith.constant 0 : i32
    %c0_i32_1 = arith.constant 0 : i32
    return %c0_i32, %c0_i32_0 : i32, i32
  }
  func.func @transform_5(%arg0: i32) -> (i32, i32) {
    %c0_i32 = arith.constant 0 : i32
    %c0_i32_0 = arith.constant 0 : i32
    return %arg0, %c0_i32 : i32, i32
  }
}

</mosaic_0001>

<bundles_post_ra>
// kernel: action_conditioned_ff_forward.1
= control target key start
LH: loop header
LB: loop body
LE: loop exit
PB: predicated region body
PF: predicated region fallthrough
CT: control target
= control target key end

     0   :  { %10 = vsyncpa [#allocation3], 0  ;;  %s672_s0 = inlined_call_operand.vmem [shape: bf16[16,16], index: 0, kind: input, shape index: {}]   ;;  %s673_s1 = inlined_call_operand.vmem [shape: bf16[16,128], index: 1, kind: input, shape index: {}]   ;;  %s674_s2 = inlined_call_operand.hbm [shape: bf16[128,128], index: 2, kind: input, shape index: {}]   ;;  %s675_s3 = inlined_call_operand.hbm [shape: bf16[128,128], index: 3, kind: input, shape index: {}]   ;;  %s676_s4 = inlined_call_operand.vmem [shape: f32[8,128], index: 4, kind: input, shape index: {}]   ;;  %s677_s5 = inlined_call_operand.vmem [shape: f32[16,1], index: 5, kind: output, shape index: {}]  }
   0x1   :  { %11 = vsyncpa [#allocation5], 0  ;;  %s565_s18 = smov [#allocation2]   ;;  %s517_s22 = scalar_lea.hbm %s674_s2, 1024 }
   0x2   :  { %s21_s19 = sshll.u32 %s565_s18, 4  ;;  %p518_p0 = scmp.ne.s32.totalorder %s674_s2, %s517_s22  ;;  %s22_s19 = int_to_ptr.vmem [resolvable:$true] %s21_s19 }
   0x3   :  { %p521_p1 = scmp.lt.u32.totalorder %s517_s22, %s674_s2 }
   0x5   :  { %p523_p2 = pnand %p521_p1, %p518_p0 }
   0x7   :  { %526 = shalt.err (!%p523_p2)
}
   0x8   :  { %s527_s27 = scalar_lea.vmem %s22_s19, 1024  ;;  %p532_p4 = scmp.lt.s32.totalorder %s22_s19, %s22_s19 }
   0x9   :  { %p528_p3 = scmp.ne.s32.totalorder %s22_s19, %s527_s27  ;;  %p533_p5 = scmp.lt.s32.totalorder %s527_s27, %s527_s27 }
   0xb   :  { %p534_p6 = por %p533_p5, %p532_p4 }
   0xd   :  { %p535_p7 = pnand %p534_p6, %p528_p3 }
   0xf   :  { %538 = shalt.err (!%p535_p7)
}
  0x10   :  { %s566_s28 = smov 64   ;;  %s567_s29 = smov 4  }
  0x11   :  { %27 = dma.hbm_to_vmem [thread:$0]  %s674_s2, 1024, %s22_s19, [#allocation3], %s566_s28, %s566_s28, %s567_s29  }
  0x12   :  { %s568_s7 = smov [#allocation4]   ;;  %s539_s11 = scalar_lea.hbm %s675_s3, 1024 }
  0x13   :  { %s33_s8 = sshll.u32 %s568_s7, 4  ;;  %p540_p8 = scmp.ne.s32.totalorder %s675_s3, %s539_s11  ;;  %s34_s8 = int_to_ptr.vmem [resolvable:$true] %s33_s8 }
  0x14   :  { %p543_p9 = scmp.lt.u32.totalorder %s539_s11, %s675_s3 }
  0x16   :  { %p545_p10 = pnand %p543_p9, %p540_p8 }
  0x18   :  { %548 = shalt.err (!%p545_p10)
}
  0x19   :  { %s549_s16 = scalar_lea.vmem %s34_s8, 1024  ;;  %p554_p12 = scmp.lt.s32.totalorder %s34_s8, %s34_s8 }
  0x1a   :  { %p550_p11 = scmp.ne.s32.totalorder %s34_s8, %s549_s16  ;;  %p555_p13 = scmp.lt.s32.totalorder %s549_s16, %s549_s16 }
  0x1c   :  { %p556_p0 = por %p555_p13, %p554_p12 }
  0x1e   :  { %p557_p1 = pnand %p556_p0, %p550_p11 }
  0x20   :  { %560 = shalt.err (!%p557_p1)
}
  0x21   :  { %39 = dma.hbm_to_vmem [thread:$0]  %s675_s3, 1024, %s34_s8, [#allocation5], %s566_s28, %s566_s28, %s567_s29  }
  0x22   :  { %561 = dma.done.wait [#allocation3], 1024  }
  0x23   :  { %562 = vsyncadd [#allocation3], 4294966272 }
  0x24   :  { %563 = dma.done.wait [#allocation5], 1024  }
  0x25   :  { %564 = vsyncadd [#allocation5], 4294966272  ;;  %v569_v0 = vmov 0.0   ;;  %vm570_vm0 = vmmov 0   ;;  %v479_v1 = vld [vmem:[%s673_s1] sm:$0xff]   ;;  %vm73_vm1 = vcmask 130048  }
  0x26   :  { %427 = vmatprep.subr.bf16.mxu0 %v569_v0  ;;  %429 = vmatprep.mubr.msk.bf16.mxu0 %vm570_vm0, %v569_v0  ;;  %v480_v2 = vld [vmem:[%s672_s0] sm:$0xff]   ;;  %v482_v4 = vld [vmem:[#allocation2 + $0x8] sm:$0xff]   ;;  %v483_v5 = vld [vmem:[#allocation2 + $0x10] sm:$0xff]   ;;  %vm372_vm2 = vcmask 7168  }
  0x27   :  { %433 = vmatprep.subr.bf16.mxu1 %v569_v0  ;;  %449 = vmatprep.mubr.msk.bf16.mxu1 %vm570_vm0, %v569_v0  ;;  %v481_v3 = vld [vmem:[#allocation2] sm:$0xff]   ;;  %v484_v6 = vld [vmem:[#allocation2 + $0x18] sm:$0xff]   ;;  %v486_v8 = vld [vmem:[#allocation2 + $0x28] sm:$0xff]  }
  0x28   :  { %428 = vmatpush3.bf16.msra.mxu0 %v479_v1  ;;  %434 = vmatpush3.bf16.msra.mxu1 %v481_v3  ;;  %v485_v7 = vld [vmem:[#allocation2 + $0x20] sm:$0xff]   ;;  %v487_v9 = vld [vmem:[#allocation2 + $0x30] sm:$0xff]   ;;  %v488_v10 = vld [vmem:[#allocation2 + $0x38] sm:$0xff]  }
  0x29   :  { %453 = vmatprep.subr.bf16.mxu0 %v569_v0  ;;  %435 = vmatprep.subr.bf16.mxu1 %v569_v0  ;;  %v489_v11 = vld [vmem:[#allocation4] sm:$0xff]   ;;  %v490_v12 = vld [vmem:[#allocation4 + $0x8] sm:$0xff]   ;;  %v491_v13 = vld [vmem:[#allocation4 + $0x10] sm:$0xff]  }
  0x2a   :  { %v492_v14 = vld [vmem:[#allocation4 + $0x18] sm:$0xff]   ;;  %v381_v15 = vld [vmem:[%s676_s4] ss:$0 sm:$0xff]  ;;  %v494_v26 = vld [vmem:[#allocation4 + $0x28] sm:$0xff]  }
  0x2b   :  { %430 = vmatmul.mubr.msk.bf16.vlgmr.msra.gmra.mrb[0].mxu0 %vm73_vm1, %v480_v2  ;;  %v493_v25 = vld [vmem:[#allocation4 + $0x20] sm:$0xff]   ;;  %v495_v27 = vld [vmem:[#allocation4 + $0x30] sm:$0xff]   ;;  %v496_v28 = vld [vmem:[#allocation4 + $0x38] sm:$0xff]  }
  0x2c   :  { %469 = vmatprep.mubr.msk.bf16.mxu0 %vm570_vm0, %v569_v0  ;;  %436 = vmatpush3.bf16.msra.mxu1 %v482_v4  ;;  %v385_v29 = vld [vmem:[%s676_s4 + $0x1] ss:$0 sm:$0xff]  ;;  %v394_v39 = vld [vmem:[%s676_s4 + $0x2] ss:$0 sm:$0xff]  ;;  %v403_v46 = vld [vmem:[%s676_s4 + $0x3] ss:$0 sm:$0xff] }
  0x2d   :  { %437 = vmatprep.subr.bf16.mxu1 %v569_v0  ;;  %454 = vmatpush3.bf16.msra.mxu0 %v489_v11  ;;  %v404_v51 = vld [vmem:[%s676_s4 + $0x4] ss:$0 sm:$0xff] }
  0x2e   :  { %455 = vmatprep.subr.bf16.mxu0 %v569_v0 }
  0x30   :  { %438 = vmatpush3.bf16.msra.mxu1 %v483_v5 }
  0x31   :  { %439 = vmatprep.subr.bf16.mxu1 %v569_v0  ;;  %456 = vmatpush3.bf16.msra.mxu0 %v490_v12 }
  0x32   :  { %457 = vmatprep.subr.bf16.mxu0 %v569_v0 }
  0x34   :  { %440 = vmatpush3.bf16.msra.mxu1 %v484_v6 }
  0x35   :  { %441 = vmatprep.subr.bf16.mxu1 %v569_v0  ;;  %458 = vmatpush3.bf16.msra.mxu0 %v491_v13 }
  0x36   :  { %459 = vmatprep.subr.bf16.mxu0 %v569_v0 }
  0x38   :  { %442 = vmatpush3.bf16.msra.mxu1 %v485_v7 }
  0x39   :  { %443 = vmatprep.subr.bf16.mxu1 %v569_v0  ;;  %460 = vmatpush3.bf16.msra.mxu0 %v492_v14 }
  0x3a   :  { %461 = vmatprep.subr.bf16.mxu0 %v569_v0 }
  0x3c   :  { %444 = vmatpush3.bf16.msra.mxu1 %v486_v8 }
  0x3d   :  { %445 = vmatprep.subr.bf16.mxu1 %v569_v0  ;;  %462 = vmatpush3.bf16.msra.mxu0 %v493_v25 }
  0x3e   :  { %463 = vmatprep.subr.bf16.mxu0 %v569_v0 }
  0x40   :  { %446 = vmatpush3.bf16.msra.mxu1 %v487_v9 }
  0x41   :  { %447 = vmatprep.subr.bf16.mxu1 %v569_v0  ;;  %464 = vmatpush3.bf16.msra.mxu0 %v494_v26 }
  0x42   :  { %465 = vmatprep.subr.bf16.mxu0 %v569_v0 }
  0x44   :  { %448 = vmatpush3.bf16.msra.mxu1 %v488_v10 }
  0x45   :  { %466 = vmatpush3.bf16.msra.mxu0 %v495_v27 }
  0x46   :  { %467 = vmatprep.subr.bf16.mxu0 %v569_v0 }
  0x49   :  { %468 = vmatpush3.bf16.msra.mxu0 %v496_v28 }
  0xfe   :  { %v111_v16 = vpop.f32.mrb[0].mxu0 }
  0xff   :  { %v112_v17 = vadd.f32 %v381_v15, %v111_v16  ;;  %v431_v18 = vpop.f32.mrb[1].mxu0 }
 0x100   :  { %v114_v19 = vpop.f32.mrb[2].mxu0 }
 0x101   :  { %v115_v20 = vadd.f32 %v381_v15, %v114_v19  ;;  %v432_v21 = vpop.f32.mrb[3].mxu0  ;;  %497 = vtanh.f32 %v112_v17 }
 0x103   :  { %499 = vtanh.f32 %v115_v20 }
 0x10b   :  { %v498_v22 = vpop.eup %497 }
 0x10d   :  { %v500_v23 = vpop.eup %499 }
 0x10e   :  { %v120_v24 = vpack.c.bf16 %v500_v23, %v498_v22 }
 0x110   :  { %450 = vmatmul.mubr.bf16.vlgmr.msra.gmra.mrb[0].mxu1 %v120_v24 }
 0x1e3   :  { %v223_v30 = vpop.f32.mrb[0].mxu1 }
 0x1e4   :  { %v224_v31 = vadd.f32 %v385_v29, %v223_v30  ;;  %v451_v32 = vpop.f32.mrb[1].mxu1 }
 0x1e5   :  { %v226_v33 = vpop.f32.mrb[2].mxu1 }
 0x1e6   :  { %v227_v34 = vadd.f32 %v385_v29, %v226_v33  ;;  %v452_v35 = vpop.f32.mrb[3].mxu1  ;;  %501 = vtanh.f32 %v224_v31 }
 0x1e8   :  { %503 = vtanh.f32 %v227_v34 }
 0x1f0   :  { %v502_v36 = vpop.eup %501 }
 0x1f2   :  { %v504_v37 = vpop.eup %503 }
 0x1f3   :  { %v232_v38 = vpack.c.bf16 %v504_v37, %v502_v36 }
 0x1f5   :  { %470 = vmatmul.mubr.bf16.vlgmr.msra.gmra.mrb[4].mxu0 %v232_v38 }
 0x2c8   :  { %v335_v40 = vpop.f32.mrb[4].mxu0 }
 0x2c9   :  { %v336_v41 = vadd.f32 %v394_v39, %v335_v40  ;;  %v471_v42 = vpop.f32.mrb[5].mxu0 }
 0x2ca   :  { %v338_v43 = vpop.f32.mrb[6].mxu0 }
 0x2cb   :  { %505 = vtanh.f32 %v336_v41  ;;  %v339_v44 = vadd.f32 %v394_v39, %v338_v43  ;;  %v472_v45 = vpop.f32.mrb[7].mxu0 }
 0x2cd   :  { %507 = vtanh.f32 %v339_v44 }
 0x2d5   :  { %v506_v47 = vpop.eup %505 }
 0x2d6   :  { %v348_v48 = vmul.f32 %v506_v47, %v403_v46 }
 0x2d7   :  { %v508_v49 = vpop.eup %507 }
 0x2d8   :  { %350 = vadd.xlane.f32.xlu0 %v348_v48  ;;  %v349_v50 = vmul.f32 %v508_v49, %v403_v46 }
 0x2dc   :  { %352 = vadd.xlane.f32.xlu0 %v349_v50 }
 0x365   :  { %v351_v52 = vpop.xlane.xlu0 %350 }
 0x366   :  { %v358_v53 = vadd.f32 %v404_v51, %v351_v52 }
 0x368   :  { %v405_v54 = vmul.f32 -1.442695, %v358_v53 }
 0x369   :  { %v353_v55 = vpop.xlane.xlu0 %352 }
 0x36a   :  { %509 = vpow2.f32 %v405_v54  ;;  %v359_v56 = vadd.f32 %v404_v51, %v353_v55 }
 0x36c   :  { %v406_v57 = vmul.f32 -1.442695, %v359_v56 }
 0x36e   :  { %511 = vpow2.f32 %v406_v57 }
 0x374   :  { %v510_v58 = vpop.eup %509 }
 0x375   :  { %v366_v59 = vadd.f32 1.0, %v510_v58 }
 0x377   :  { %513 = vrcp.f32 %v366_v59 }
 0x378   :  { %v512_v60 = vpop.eup %511 }
 0x379   :  { %v367_v61 = vadd.f32 1.0, %v512_v60 }
 0x37b   :  { %515 = vrcp.f32 %v367_v61 }
 0x381   :  { %v514_v62 = vpop.eup %513 }
 0x382   :  { %373 = vst.msk [vmem:[%s677_s5] sm:$0xff] %vm372_vm2, %v514_v62 }
 0x385   :  { %v516_v63 = vpop.eup %515 }
 0x386   :  { %374 = vst.msk [vmem:[%s677_s5 + $0x8] sm:$0xff] %vm372_vm2, %v516_v63 }
 0x387   :  { %379 = vsyncpa [#allocation3], 1 }
 0x388   :  { %380 = vsyncpa [#allocation5], 1 }

</bundles_post_ra>
